<compile_context>
chip_gen: v6e
topology: v6e:2x2x1
jax: 0.10.0
libtpu: 0.0.40
codegen_flags: <defaults>
</compile_context>

<pallas_src>
import functools

import jax
import jax.numpy as jnp
from jax.experimental import pallas as pl
from jax.experimental.pallas import tpu as pltpu

LANE = 128


def _round_up(x, m):
    return ((x + m - 1) // m) * m


def dueling_kernel(state_ref, w1_ref, b1_ref, w2_ref, b2_ref, w3_ref, b3_ref,
                   out_ref):
    # fc1 + ReLU  (bf16 operands, f32 accumulate / elementwise)
    x = jnp.dot(state_ref[...].astype(jnp.bfloat16), w1_ref[...],
                preferred_element_type=jnp.float32) + b1_ref[...]
    x = jnp.maximum(x, 0.0)

    # fused fc2_val | fc2_adv + ReLU  -> y = [val | adv]
    y = jnp.dot(x.astype(jnp.bfloat16), w2_ref[...],
                preferred_element_type=jnp.float32) + b2_ref[...]
    y = jnp.maximum(y, 0.0)

    # fused head: Q = val@W3v (broadcast) + adv@(W3a - mean_j W3a) + b3_fused
    q = jnp.dot(y.astype(jnp.bfloat16), w3_ref[...],
                preferred_element_type=jnp.float32) + b3_ref[...]
    out_ref[...] = q.astype(out_ref.dtype)


def fuse_params(params, state_size, action_size, fc1_units=64, fc2_units=256):
    """One-time host-side prep: fuse/pad/center weights, cast to bf16."""
    fc1_pad = _round_up(fc1_units, LANE)
    a_pad = _round_up(action_size, LANE)

    # fc1: pad output (lane) dim 64 -> 128 with zeros (zero cols + zero bias
    # => padded activations are exactly 0 after ReLU).
    w1 = jnp.zeros((state_size, fc1_pad), jnp.float32)
    w1 = w1.at[:, :fc1_units].set(params["w1"])
    b1 = jnp.zeros((1, fc1_pad), jnp.float32)
    b1 = b1.at[:, :fc1_units].set(params["b1"])

    # fc2_val | fc2_adv fused along the output dim; pad input rows 64 -> 128.
    w2 = jnp.zeros((fc1_pad, 2 * fc2_units), jnp.float32)
    w2 = w2.at[:fc1_units, :fc2_units].set(params["w2v"])
    w2 = w2.at[:fc1_units, fc2_units:].set(params["w2a"])
    b2 = jnp.concatenate([params["b2v"], params["b2a"]], axis=1)

    # Dueling mean folded into the advantage weights (exact identity):
    #   mean_j(adv @ W3a + b3a) = adv @ mean_j(W3a) + mean(b3a)
    w3a_c = params["w3a"] - jnp.mean(params["w3a"], axis=1, keepdims=True)
    b3a_c = params["b3a"] - jnp.mean(params["b3a"])

    # Fused head weight [2*fc2, a_pad]:
    #   top    fc2 rows : value-head column vector broadcast into every real
    #                     action column (replaces the N=1 matmul)
    #   bottom fc2 rows : centered advantage weights
    w3 = jnp.zeros((2 * fc2_units, a_pad), jnp.float32)
    w3 = w3.at[:fc2_units, :action_size].set(
        jnp.tile(params["w3v"], (1, action_size)))
    w3 = w3.at[fc2_units:, :action_size].set(w3a_c)
    b3 = jnp.zeros((1, a_pad), jnp.float32)
    b3 = b3.at[:, :action_size].set(params["b3v"] + b3a_c)

    # Weights in bf16 for the MXU; biases stay f32 (added post-accumulation).
    return dict(
        w1=w1.astype(jnp.bfloat16), b1=b1,
        w2=w2.astype(jnp.bfloat16), b2=b2,
        w3=w3.astype(jnp.bfloat16), b3=b3,
    )


@functools.partial(jax.jit, static_argnames=("action_size", "tile_b"))
def dueling_forward(state, fused, action_size, tile_b=256):
    batch, state_size = state.shape
    a_pad = fused["w3"].shape[1]

    # Batch tiling: don't over-pad tiny batches, keep the tile VMEM-friendly
    # for v7x's smaller (64 MiB) VMEM even at the default 256-row tile.
    tile_b = min(tile_b, _round_up(batch, 8))
    b_pad = _round_up(batch, tile_b)
    if b_pad != batch:
        state = jnp.pad(state, ((0, b_pad - batch), (0, 0)))

    weights = (fused["w1"], fused["b1"], fused["w2"], fused["b2"],
               fused["w3"], fused["b3"])

    in_specs = [pl.BlockSpec((tile_b, state_size), lambda i: (i, 0))]
    # Constant index_map -> weights DMA'd once and stay resident in VMEM.
    in_specs += [pl.BlockSpec(w.shape, lambda i: (0, 0)) for w in weights]
    out_specs = pl.BlockSpec((tile_b, a_pad), lambda i: (i, 0))

    out = pl.pallas_call(
        dueling_kernel,
        out_shape=jax.ShapeDtypeStruct((b_pad, a_pad), jnp.float32),
        grid=(b_pad // tile_b,),
        in_specs=in_specs,
        out_specs=out_specs,
        compiler_params=pltpu.CompilerParams(
            dimension_semantics=("parallel",)),
    )(state, *weights)

    # Strip batch and lane padding outside the kernel.
    return out[:batch, :action_size]


def init_params(key, state_size, action_size, fc1_units=64, fc2_units=256):
    """Deterministic init mimicking nn.Linear default (uniform +-1/sqrt(fan_in)).
    Weights stored pre-transposed as [in_features, out_features]."""
    def linear(key, fan_in, fan_out):
        kw, kb = jax.random.split(key)
        bound = 1.0 / jnp.sqrt(fan_in)
        w = jax.random.uniform(kw, (fan_in, fan_out), jnp.float32, -bound, bound)
        b = jax.random.uniform(kb, (1, fan_out), jnp.float32, -bound, bound)
        return w, b

    k1, k2, k3, k4, k5 = jax.random.split(key, 5)
    w1, b1 = linear(k1, state_size, fc1_units)
    w2v, b2v = linear(k2, fc1_units, fc2_units)
    w2a, b2a = linear(k3, fc1_units, fc2_units)
    w3v, b3v = linear(k4, fc2_units, 1)
    w3a, b3a = linear(k5, fc2_units, action_size)
    return dict(w1=w1, b1=b1, w2v=w2v, b2v=b2v, w2a=w2a, b2a=b2a,
                w3v=w3v, b3v=b3v, w3a=w3a, b3a=b3a)


def reference_forward(state, params):
    """Pure-f32 reference with the original (unfused) structure."""
    x = jnp.maximum(state @ params["w1"] + params["b1"], 0.0)
    val = jnp.maximum(x @ params["w2v"] + params["b2v"], 0.0)
    adv = jnp.maximum(x @ params["w2a"] + params["b2a"], 0.0)
    v = val @ params["w3v"] + params["b3v"]
    a = adv @ params["w3a"] + params["b3a"]
    return v + a - jnp.mean(a, axis=1, keepdims=True)


if __name__ == "__main__":
    state_size = 16
    action_size = 4
    batch = 2

    key = jax.random.PRNGKey(0)
    k_params, k_state = jax.random.split(key)
    params = init_params(k_params, state_size, action_size)
    state = jax.random.normal(k_state, (batch, state_size), jnp.float32)

    fused = fuse_params(params, state_size, action_size)
    out = dueling_forward(state, fused, action_size)
    out = jax.block_until_ready(out)

    ref = reference_forward(state, params)
    assert out.shape == (batch, action_size)
    # bf16 MXU operands with f32 accumulation -> small numerical drift vs f32 ref.
    assert jnp.allclose(out, ref, atol=5e-2, rtol=5e-2), "mismatch vs reference"

    print("KERNEL_OK")
</pallas_src>

<mosaic_0001>
module attributes {stable_mosaic.version = 11 : i64} {
  func.func @dueling_kernel(%arg0: i32, %arg1: memref<8x16xf32, #tpu.memory_space<vmem>>, %arg2: memref<16x128xbf16, #tpu.memory_space<vmem>>, %arg3: memref<1x128xf32, #tpu.memory_space<vmem>>, %arg4: memref<128x512xbf16, #tpu.memory_space<vmem>>, %arg5: memref<1x512xf32, #tpu.memory_space<vmem>>, %arg6: memref<512x128xbf16, #tpu.memory_space<vmem>>, %arg7: memref<1x128xf32, #tpu.memory_space<vmem>>, %arg8: memref<8x128xf32, #tpu.memory_space<vmem>>) attributes {dimension_semantics = [#tpu.dimension_semantics<parallel>], iteration_bounds = array<i64: 1>, scalar_prefetch = 0 : i64, scratch_operands = 0 : i64, tpu.core_type = #tpu.core_type<tc>, window_params = [{transform_indices = @transform_0, window_bounds = array<i64: 8, 16>}, {pipeline_mode = #tpu.pipeline_mode<synchronous>, transform_indices = @transform_1, window_bounds = array<i64: 16, 128>}, {pipeline_mode = #tpu.pipeline_mode<synchronous>, transform_indices = @transform_2, window_bounds = array<i64: 1, 128>}, {pipeline_mode = #tpu.pipeline_mode<synchronous>, transform_indices = @transform_3, window_bounds = array<i64: 128, 512>}, {pipeline_mode = #tpu.pipeline_mode<synchronous>, transform_indices = @transform_4, window_bounds = array<i64: 1, 512>}, {pipeline_mode = #tpu.pipeline_mode<synchronous>, transform_indices = @transform_5, window_bounds = array<i64: 512, 128>}, {pipeline_mode = #tpu.pipeline_mode<synchronous>, transform_indices = @transform_6, window_bounds = array<i64: 1, 128>}, {transform_indices = @transform_7, window_bounds = array<i64: 8, 128>}]} {
    %c0 = arith.constant 0 : index
    %c0_0 = arith.constant 0 : index
    %0 = vector.load %arg1[%c0, %c0_0] : memref<8x16xf32, #tpu.memory_space<vmem>>, vector<8x16xf32>
    %1 = arith.truncf %0 : vector<8x16xf32> to vector<8x16xbf16>
    %c0_1 = arith.constant 0 : index
    %c0_2 = arith.constant 0 : index
    %2 = vector.load %arg2[%c0_1, %c0_2] : memref<16x128xbf16, #tpu.memory_space<vmem>>, vector<16x128xbf16>
    %cst = arith.constant dense<0.000000e+00> : vector<8x128xf32>
    %3 = tpu.matmul %1, %2, %cst {dimension_numbers = #tpu.dot_dimension_numbers<[1], [0], [0], [1], [0, 0, 1, 1], [], []>} : vector<8x16xbf16>, vector<16x128xbf16>, vector<8x128xf32> -> vector<8x128xf32>
    %c0_3 = arith.constant 0 : index
    %c0_4 = arith.constant 0 : index
    %4 = vector.load %arg3[%c0_3, %c0_4] : memref<1x128xf32, #tpu.memory_space<vmem>>, vector<1x128xf32>
    %5 = vector.broadcast %4 : vector<1x128xf32> to vector<8x128xf32>
    %6 = arith.addf %3, %5 : vector<8x128xf32>
    %cst_5 = arith.constant 0.000000e+00 : f32
    %7 = vector.broadcast %cst_5 : f32 to vector<8x128xf32>
    %8 = arith.maximumf %6, %7 : vector<8x128xf32>
    %9 = arith.truncf %8 : vector<8x128xf32> to vector<8x128xbf16>
    %c0_6 = arith.constant 0 : index
    %c0_7 = arith.constant 0 : index
    %10 = vector.load %arg4[%c0_6, %c0_7] : memref<128x512xbf16, #tpu.memory_space<vmem>>, vector<128x512xbf16>
    %cst_8 = arith.constant dense<0.000000e+00> : vector<8x512xf32>
    %11 = tpu.matmul %9, %10, %cst_8 {dimension_numbers = #tpu.dot_dimension_numbers<[1], [0], [0], [1], [0, 0, 1, 1], [], []>} : vector<8x128xbf16>, vector<128x512xbf16>, vector<8x512xf32> -> vector<8x512xf32>
    %c0_9 = arith.constant 0 : index
    %c0_10 = arith.constant 0 : index
    %12 = vector.load %arg5[%c0_9, %c0_10] : memref<1x512xf32, #tpu.memory_space<vmem>>, vector<1x512xf32>
    %13 = vector.broadcast %12 : vector<1x512xf32> to vector<8x512xf32>
    %14 = arith.addf %11, %13 : vector<8x512xf32>
    %cst_11 = arith.constant 0.000000e+00 : f32
    %15 = vector.broadcast %cst_11 : f32 to vector<8x512xf32>
    %16 = arith.maximumf %14, %15 : vector<8x512xf32>
    %17 = arith.truncf %16 : vector<8x512xf32> to vector<8x512xbf16>
    %c0_12 = arith.constant 0 : index
    %c0_13 = arith.constant 0 : index
    %18 = vector.load %arg6[%c0_12, %c0_13] : memref<512x128xbf16, #tpu.memory_space<vmem>>, vector<512x128xbf16>
    %cst_14 = arith.constant dense<0.000000e+00> : vector<8x128xf32>
    %19 = tpu.matmul %17, %18, %cst_14 {dimension_numbers = #tpu.dot_dimension_numbers<[1], [0], [0], [1], [0, 0, 1, 1], [], []>} : vector<8x512xbf16>, vector<512x128xbf16>, vector<8x128xf32> -> vector<8x128xf32>
    %c0_15 = arith.constant 0 : index
    %c0_16 = arith.constant 0 : index
    %20 = vector.load %arg7[%c0_15, %c0_16] : memref<1x128xf32, #tpu.memory_space<vmem>>, vector<1x128xf32>
    %21 = vector.broadcast %20 : vector<1x128xf32> to vector<8x128xf32>
    %22 = arith.addf %19, %21 : vector<8x128xf32>
    %c0_17 = arith.constant 0 : index
    %c0_18 = arith.constant 0 : index
    %23 = vector.load %arg8[%c0_17, %c0_18] : memref<8x128xf32, #tpu.memory_space<vmem>>, vector<8x128xf32>
    tpu.vector_store %arg8[%c0_17, %c0_18], %22 {strides = array<i32>} : memref<8x128xf32, #tpu.memory_space<vmem>>, vector<8x128xf32>,
    return
  }
  func.func @transform_0(%arg0: i32) -> (i32, i32) {
    %c0_i32 = arith.constant 0 : i32
    %c0_i32_0 = arith.constant 0 : i32
    return %arg0, %c0_i32 : i32, i32
  }
  func.func @transform_1(%arg0: i32) -> (i32, i32) {
    %c0_i32 = arith.constant 0 : i32
    %c0_i32_0 = arith.constant 0 : i32
    %c0_i32_1 = arith.constant 0 : i32
    return %c0_i32, %c0_i32_0 : i32, i32
  }
  func.func @transform_2(%arg0: i32) -> (i32, i32) {
    %c0_i32 = arith.constant 0 : i32
    %c0_i32_0 = arith.constant 0 : i32
    %c0_i32_1 = arith.constant 0 : i32
    return %c0_i32, %c0_i32_0 : i32, i32
  }
  func.func @transform_3(%arg0: i32) -> (i32, i32) {
    %c0_i32 = arith.constant 0 : i32
    %c0_i32_0 = arith.constant 0 : i32
    %c0_i32_1 = arith.constant 0 : i32
    return %c0_i32, %c0_i32_0 : i32, i32
  }
  func.func @transform_4(%arg0: i32) -> (i32, i32) {
    %c0_i32 = arith.constant 0 : i32
    %c0_i32_0 = arith.constant 0 : i32
    %c0_i32_1 = arith.constant 0 : i32
    return %c0_i32, %c0_i32_0 : i32, i32
  }
  func.func @transform_5(%arg0: i32) -> (i32, i32) {
    %c0_i32 = arith.constant 0 : i32
    %c0_i32_0 = arith.constant 0 : i32
    %c0_i32_1 = arith.constant 0 : i32
    return %c0_i32, %c0_i32_0 : i32, i32
  }
  func.func @transform_6(%arg0: i32) -> (i32, i32) {
    %c0_i32 = arith.constant 0 : i32
    %c0_i32_0 = arith.constant 0 : i32
    %c0_i32_1 = arith.constant 0 : i32
    return %c0_i32, %c0_i32_0 : i32, i32
  }
  func.func @transform_7(%arg0: i32) -> (i32, i32) {
    %c0_i32 = arith.constant 0 : i32
    %c0_i32_0 = arith.constant 0 : i32
    return %arg0, %c0_i32 : i32, i32
  }
}

</mosaic_0001>

<bundles_post_ra>
// kernel: dueling_forward.1
= control target key start
LH: loop header
LB: loop body
LE: loop exit
PB: predicated region body
PF: predicated region fallthrough
CT: control target
= control target key end

     0   :  { %12 = vsyncpa [#allocation3], 0  ;;  %s1099_s0 = inlined_call_operand.vmem [shape: f32[8,16], index: 0, kind: input, shape index: {}]   ;;  %s1100_s1 = inlined_call_operand.vmem [shape: bf16[16,128], index: 1, kind: input, shape index: {}]   ;;  %s1101_s2 = inlined_call_operand.vmem [shape: f32[1,128], index: 2, kind: input, shape index: {}]   ;;  %s1102_s3 = inlined_call_operand.hbm [shape: bf16[128,512], index: 3, kind: input, shape index: {}]   ;;  %s1103_s4 = inlined_call_operand.vmem [shape: f32[1,512], index: 4, kind: input, shape index: {}]   ;;  %s1104_s5 = inlined_call_operand.hbm [shape: bf16[512,128], index: 5, kind: input, shape index: {}]   ;;  %s1105_s6 = inlined_call_operand.vmem [shape: f32[1,128], index: 6, kind: input, shape index: {}]   ;;  %s1106_s7 = inlined_call_operand.vmem [shape: f32[8,128], index: 7, kind: output, shape index: {}]  }
   0x1   :  { %13 = vsyncpa [#allocation5], 0  ;;  %s1026_s24 = smov [#allocation2]  }
   0x2   :  { %s25_s25 = sshll.u32 %s1026_s24, 4  ;;  %s26_s25 = int_to_ptr.vmem [resolvable:$true] %s25_s25 }
   0x3   :  { %s990_s26 = scalar_lea.vmem %s26_s25, 4096  ;;  %p995_p1 = scmp.lt.s32.totalorder %s26_s25, %s26_s25 }
   0x4   :  { %p991_p0 = scmp.ne.s32.totalorder %s26_s25, %s990_s26  ;;  %p996_p2 = scmp.lt.s32.totalorder %s990_s26, %s990_s26 }
   0x6   :  { %p997_p3 = por %p996_p2, %p995_p1 }
   0x8   :  { %p998_p4 = pnand %p997_p3, %p991_p0 }
   0xa   :  { %1001 = shalt.err (!%p998_p4)
}
   0xb   :  { %s1027_s27 = smov 256   ;;  %s1028_s28 = smov 16  }
   0xc   :  { %31 = dma.hbm_to_vmem [thread:$0]  %s1102_s3, 4096, %s26_s25, [#allocation3], %s1027_s27, %s1027_s27, %s1028_s28  }
   0xd   :  { %s1029_s8 = smov [#allocation4]  }
   0xe   :  { %s39_s9 = sshll.u32 %s1029_s8, 4  ;;  %s40_s9 = int_to_ptr.vmem [resolvable:$true] %s39_s9 }
   0xf   :  { %s1010_s10 = scalar_lea.vmem %s40_s9, 4096  ;;  %p1015_p6 = scmp.lt.s32.totalorder %s40_s9, %s40_s9 }
  0x10   :  { %p1011_p5 = scmp.ne.s32.totalorder %s40_s9, %s1010_s10  ;;  %p1016_p7 = scmp.lt.s32.totalorder %s1010_s10, %s1010_s10 }
  0x12   :  { %p1017_p8 = por %p1016_p7, %p1015_p6 }
  0x14   :  { %p1018_p9 = pnand %p1017_p8, %p1011_p5 }
  0x16   :  { %1021 = shalt.err (!%p1018_p9)
}
  0x17   :  { %s1030_s11 = smov 64   ;;  %s1031_s12 = smov 4  }
  0x18   :  { %45 = dma.hbm_to_vmem [thread:$0]  %s1104_s5, 4096, %s40_s9, [#allocation5], %s1030_s11, %s1030_s11, %s1031_s12  }
  0x19   :  { %1022 = dma.done.wait [#allocation3], 4096  }
  0x1a   :  { %1023 = vsyncadd [#allocation3], 4294963200 }
  0x1b   :  { %1024 = dma.done.wait [#allocation5], 4096  }
  0x1c   :  { %1025 = vsyncadd [#allocation5], 4294963200  ;;  %v1032_v0 = vmov 0.0   ;;  %vm1033_vm0 = vmmov 0   ;;  %v901_v1 = vld [vmem:[%s1100_s1] sm:$0xff]   ;;  %vm72_vm1 = vcmask 130048  }
  0x1d   :  { %886 = vmatprep.subr.bf16.mxu0 %v1032_v0  ;;  %888 = vmatprep.mubr.msk.bf16.mxu0 %vm1033_vm0, %v1032_v0  ;;  %v55_v2 = vld [vmem:[%s1099_s0] sm:$0xff]  ;;  %v904_v5 = vld [vmem:[#allocation2 + $0xe8] ss:$16 sps:$4 sm:$0xff]   ;;  %v906_v6 = vld [vmem:[#allocation2 + $0xec] ss:$16 sps:$4 sm:$0xff]   ;;  %v1034_v36 = vmov 0  }
  0x1e   :  { %887 = vmatpush3.bf16.msra.mxu0 %v901_v1  ;;  %v56_v3 = vpack.c.bf16 %v55_v2, %v55_v2  ;;  %v902_v4 = vld [vmem:[#allocation2 + $0xe4] ss:$16 sps:$4 sm:$0xff]   ;;  %v907_v7 = vld [vmem:[#allocation2 + $0xe0] ss:$16 sps:$4 sm:$0xff]   ;;  %v910_v9 = vld [vmem:[#allocation2 + $0xc8] ss:$16 sps:$4 sm:$0xff]   ;;  %364 = vmatprep.mubr.bf16.mxu1 %v1034_v36 }
  0x1f   :  { %332 = vmatprep.subr.bf16.mxu1 %v902_v4  ;;  %v908_v8 = vld [vmem:[#allocation2 + $0xc4] ss:$16 sps:$4 sm:$0xff]   ;;  %373 = vmatprep.subr.bf16.mxu0 %v906_v6  ;;  %v912_v10 = vld [vmem:[#allocation2 + $0xcc] ss:$16 sps:$4 sm:$0xff]   ;;  %v913_v11 = vld [vmem:[#allocation2 + $0xc0] ss:$16 sps:$4 sm:$0xff]  }
  0x20   :  { %333 = vmatpush1.bf16.msra.mxu1 %v907_v7  ;;  %v914_v12 = vld [vmem:[#allocation2 + $0xa4] ss:$16 sps:$4 sm:$0xff]   ;;  %v918_v13 = vld [vmem:[#allocation2 + $0xac] ss:$16 sps:$4 sm:$0xff]   ;;  %v916_v14 = vld [vmem:[#allocation2 + $0xa8] ss:$16 sps:$4 sm:$0xff]  }
  0x21   :  { %889 = vmatmul.mubr.msk.bf16.vlgmr.msra.gmra.mxu0 %vm72_vm1, %v56_v3  ;;  %334 = vmatprep.subr.bf16.mxu1 %v908_v8  ;;  %v919_v15 = vld [vmem:[#allocation2 + $0xa0] ss:$16 sps:$4 sm:$0xff]   ;;  %v920_v16 = vld [vmem:[#allocation2 + $0x84] ss:$16 sps:$4 sm:$0xff]   ;;  %v924_v17 = vld [vmem:[#allocation2 + $0x8c] ss:$16 sps:$4 sm:$0xff]  }
  0x22   :  { %374 = vmatpush1.bf16.msra.mxu0 %v904_v5  ;;  %v922_v18 = vld [vmem:[#allocation2 + $0x88] ss:$16 sps:$4 sm:$0xff]   ;;  %v925_v19 = vld [vmem:[#allocation2 + $0x80] ss:$16 sps:$4 sm:$0xff]   ;;  %v926_v20 = vld [vmem:[#allocation2 + $0x64] ss:$16 sps:$4 sm:$0xff]   ;;  %405 = vmatprep.mubr.bf16.mxu0 %v1034_v36 }
  0x23   :  { %375 = vmatprep.subr.bf16.mxu0 %v912_v10  ;;  %v930_v21 = vld [vmem:[#allocation2 + $0x6c] ss:$16 sps:$4 sm:$0xff]   ;;  %v928_v22 = vld [vmem:[#allocation2 + $0x68] ss:$16 sps:$4 sm:$0xff]   ;;  %v931_v23 = vld [vmem:[#allocation2 + $0x60] ss:$16 sps:$4 sm:$0xff]  }
  0x24   :  { %335 = vmatpush1.bf16.msra.mxu1 %v913_v11  ;;  %v932_v24 = vld [vmem:[#allocation2 + $0x44] ss:$16 sps:$4 sm:$0xff]   ;;  %v936_v25 = vld [vmem:[#allocation2 + $0x4c] ss:$16 sps:$4 sm:$0xff]   ;;  %v934_v26 = vld [vmem:[#allocation2 + $0x48] ss:$16 sps:$4 sm:$0xff]  }
  0x25   :  { %336 = vmatprep.subr.bf16.mxu1 %v914_v12  ;;  %v937_v27 = vld [vmem:[#allocation2 + $0x40] ss:$16 sps:$4 sm:$0xff]   ;;  %v938_v28 = vld [vmem:[#allocation2 + $0x24] ss:$16 sps:$4 sm:$0xff]   ;;  %v942_v29 = vld [vmem:[#allocation2 + $0x2c] ss:$16 sps:$4 sm:$0xff]  }
  0x26   :  { %376 = vmatpush1.bf16.msra.mxu0 %v910_v9  ;;  %v940_v30 = vld [vmem:[#allocation2 + $0x28] ss:$16 sps:$4 sm:$0xff]   ;;  %v943_v31 = vld [vmem:[#allocation2 + $0x20] ss:$16 sps:$4 sm:$0xff]   ;;  %v944_v32 = vld [vmem:[#allocation2 + $0x4] ss:$16 sps:$4 sm:$0xff]  }
  0x27   :  { %377 = vmatprep.subr.bf16.mxu0 %v918_v13  ;;  %v948_v33 = vld [vmem:[#allocation2 + $0xc] ss:$16 sps:$4 sm:$0xff]   ;;  %v946_v34 = vld [vmem:[#allocation2 + $0x8] ss:$16 sps:$4 sm:$0xff]   ;;  %v949_v35 = vld [vmem:[#allocation2] ss:$16 sps:$4 sm:$0xff]   ;;  %v152_v13 = vlaneseq }
  0x28   :  { %337 = vmatpush1.bf16.msra.mxu1 %v919_v15  ;;  %v950_v37 = vld [vmem:[#allocation4 + $0x78] sm:$0xff]   ;;  %v772_v39 = vld [vmem:[%s1101_s2] ss:$0 sm:$0xff]  ;;  %v954_v48 = vld [vmem:[#allocation4 + $0x70] sm:$0xff]  }
  0x29   :  { %338 = vmatprep.subr.bf16.mxu1 %v920_v16  ;;  %v951_v38 = vld [vmem:[#allocation4 + $0xf8] sm:$0xff]   ;;  %v955_v49 = vld [vmem:[#allocation4 + $0xf0] sm:$0xff]   ;;  %v958_v53 = vld [vmem:[#allocation4 + $0x68] sm:$0xff]  }
  0x2a   :  { %378 = vmatpush1.bf16.msra.mxu0 %v916_v14  ;;  %v952_v45 = vld [vmem:[#allocation4 + $0x38] sm:$0xff]   ;;  %v956_v51 = vld [vmem:[#allocation4 + $0x30] sm:$0xff]   ;;  %v959_v54 = vld [vmem:[#allocation4 + $0xe8] sm:$0xff]   ;;  %v153_v14 = vshrl.u32 %v152_v13, 7 }
  0x2b   :  { %379 = vmatprep.subr.bf16.mxu0 %v924_v17  ;;  %v953_v46 = vld [vmem:[#allocation4 + $0xb8] sm:$0xff]   ;;  %v957_v52 = vld [vmem:[#allocation4 + $0xb0] sm:$0xff]   ;;  %v960_v55 = vld [vmem:[#allocation4 + $0x28] sm:$0xff]  }
  0x2c   :  { %339 = vmatpush1.bf16.msra.mxu1 %v925_v19  ;;  %v961_v56 = vld [vmem:[#allocation4 + $0xa8] sm:$0xff]   ;;  %v962_v57 = vld [vmem:[#allocation4 + $0x60] sm:$0xff]   ;;  %v966_v61 = vld [vmem:[#allocation4 + $0x58] sm:$0xff]   ;;  %v154_v15 = vsub.s32 0, %v153_v14  ;;  %v162_v16 = vsub.s32 2, %v153_v14  ;;  %v166_v19 = vsub.s32 3, %v153_v14 }
  0x2d   :  { %340 = vmatprep.subr.bf16.mxu1 %v926_v20  ;;  %v963_v58 = vld [vmem:[#allocation4 + $0xe0] sm:$0xff]   ;;  %v967_v62 = vld [vmem:[#allocation4 + $0xd8] sm:$0xff]   ;;  %v970_v1 = vld [vmem:[#allocation4 + $0x50] sm:$0xff]  }
  0x2e   :  { %380 = vmatpush1.bf16.msra.mxu0 %v922_v18  ;;  %v964_v59 = vld [vmem:[#allocation4 + $0x20] sm:$0xff]   ;;  %v968_v63 = vld [vmem:[#allocation4 + $0x18] sm:$0xff]   ;;  %v971_v2 = vld [vmem:[#allocation4 + $0xd0] sm:$0xff]   ;;  %v158_v18 = vsub.s32 1, %v153_v14 }
  0x2f   :  { %381 = vmatprep.subr.bf16.mxu0 %v930_v21  ;;  %v965_v60 = vld [vmem:[#allocation4 + $0xa0] sm:$0xff]   ;;  %v969_v0 = vld [vmem:[#allocation4 + $0x98] sm:$0xff]   ;;  %v972_v3 = vld [vmem:[#allocation4 + $0x10] sm:$0xff]  }
  0x30   :  { %341 = vmatpush1.bf16.msra.mxu1 %v931_v23  ;;  %v973_v4 = vld [vmem:[#allocation4 + $0x90] sm:$0xff]   ;;  %v974_v5 = vld [vmem:[#allocation4 + $0x48] sm:$0xff]   ;;  %v978_v9 = vld [vmem:[#allocation4 + $0x40] sm:$0xff]  }
  0x31   :  { %342 = vmatprep.subr.bf16.mxu1 %v932_v24  ;;  %v975_v6 = vld [vmem:[#allocation4 + $0xc8] sm:$0xff]   ;;  %v979_v10 = vld [vmem:[#allocation4 + $0xc0] sm:$0xff]  }
  0x32   :  { %382 = vmatpush1.bf16.msra.mxu0 %v928_v22  ;;  %v976_v7 = vld [vmem:[#allocation4 + $0x8] sm:$0xff]   ;;  %v980_v11 = vld [vmem:[#allocation4] sm:$0xff]  }
  0x33   :  { %383 = vmatprep.subr.bf16.mxu0 %v936_v25  ;;  %v977_v8 = vld [vmem:[#allocation4 + $0x88] sm:$0xff]   ;;  %v981_v12 = vld [vmem:[#allocation4 + $0x80] sm:$0xff]  }
  0x34   :  { %343 = vmatpush1.bf16.msra.mxu1 %v937_v27  ;;  %v150_v17 = vld [vmem:[%s1103_s4] sm:$0xf] }
  0x35   :  { %344 = vmatprep.subr.bf16.mxu1 %v938_v28  ;;  %v155_v20 = vrot.slane %v150_v17, %v154_v15  ;;  %v163_v21 = vrot.slane %v150_v17, %v162_v16  ;;  %v159_v22 = vrot.slane %v150_v17, %v158_v18  ;;  %v167_v23 = vrot.slane %v150_v17, %v166_v19 }
  0x36   :  { %384 = vmatpush1.bf16.msra.mxu0 %v934_v26 }
  0x37   :  { %385 = vmatprep.subr.bf16.mxu0 %v942_v29 }
  0x38   :  { %345 = vmatpush1.bf16.msra.mxu1 %v943_v31 }
  0x39   :  { %346 = vmatprep.subr.bf16.mxu1 %v944_v32 }
  0x3a   :  { %386 = vmatpush1.bf16.msra.mxu0 %v940_v30 }
  0x3b   :  { %387 = vmatprep.subr.bf16.mxu0 %v948_v33 }
  0x3c   :  { %347 = vmatpush1.bf16.msra.mxu1 %v949_v35 }
  0x3d   :  { %842 = vmatprep.subr.bf16.mxu1 %v950_v37 }
  0x3e   :  { %388 = vmatpush1.bf16.msra.mxu0 %v946_v34 }
  0x3f   :  { %864 = vmatprep.subr.bf16.mxu0 %v951_v38 }
  0xe1   :  { %v110_v40 = vpop.f32.mrf.mxu0 }
  0xe2   :  { %v111_v41 = vadd.f32 %v772_v39, %v110_v40 }
  0xe3   :  { %v890_v42 = vpop.f32.mrf.mxu0 }
  0xe4   :  { %v116_v43 = vmax.f32 %v111_v41, 0.0 }
  0xe5   :  { %v113_v44 = vpop.f32.mrf.mxu0 }
  0xe6   :  { %v117_v47 = vpack.c.bf16 %v116_v43, %v116_v43 }
  0xe7   :  { %v891_v50 = vpop.f32.mrf.mxu0 }
  0xe8   :  { %365 = vmatmul.mubr.bf16.vlgmr.msra.gmra.mxu1 %v117_v47  ;;  %406 = vmatmul.mubr.bf16.vlgmr.msra.gmra.mxu0 %v117_v47 }
  0xe9   :  { %843 = vmatpush3.bf16.msra.mxu1 %v952_v45  ;;  %865 = vmatpush3.bf16.msra.mxu0 %v953_v46  ;;  %v807_v46 = vld [vmem:[%s1105_s6] ss:$0 sm:$0xff] }
  0xea   :  { %844 = vmatprep.subr.bf16.mxu1 %v954_v48  ;;  %866 = vmatprep.subr.bf16.mxu0 %v955_v49 }
  0xed   :  { %845 = vmatpush3.bf16.msra.mxu1 %v956_v51  ;;  %867 = vmatpush3.bf16.msra.mxu0 %v957_v52 }
  0xee   :  { %846 = vmatprep.subr.bf16.mxu1 %v958_v53  ;;  %868 = vmatprep.subr.bf16.mxu0 %v959_v54 }
  0xf1   :  { %847 = vmatpush3.bf16.msra.mxu1 %v960_v55  ;;  %869 = vmatpush3.bf16.msra.mxu0 %v961_v56 }
  0xf2   :  { %848 = vmatprep.subr.bf16.mxu1 %v962_v57  ;;  %870 = vmatprep.subr.bf16.mxu0 %v963_v58 }
  0xf5   :  { %849 = vmatpush3.bf16.msra.mxu1 %v964_v59  ;;  %871 = vmatpush3.bf16.msra.mxu0 %v965_v60 }
  0xf6   :  { %850 = vmatprep.subr.bf16.mxu1 %v966_v61  ;;  %872 = vmatprep.subr.bf16.mxu0 %v967_v62 }
  0xf9   :  { %851 = vmatpush3.bf16.msra.mxu1 %v968_v63  ;;  %873 = vmatpush3.bf16.msra.mxu0 %v969_v0 }
  0xfa   :  { %852 = vmatprep.subr.bf16.mxu1 %v970_v1  ;;  %874 = vmatprep.subr.bf16.mxu0 %v971_v2 }
  0xfd   :  { %853 = vmatpush3.bf16.msra.mxu1 %v972_v3  ;;  %875 = vmatpush3.bf16.msra.mxu0 %v973_v4 }
  0xfe   :  { %854 = vmatprep.subr.bf16.mxu1 %v974_v5  ;;  %876 = vmatprep.subr.bf16.mxu0 %v975_v6 }
 0x101   :  { %855 = vmatpush3.bf16.msra.mxu1 %v976_v7  ;;  %877 = vmatpush3.bf16.msra.mxu0 %v977_v8 }
 0x102   :  { %856 = vmatprep.subr.bf16.mxu1 %v978_v9  ;;  %878 = vmatprep.subr.bf16.mxu0 %v979_v10 }
 0x105   :  { %857 = vmatpush3.bf16.msra.mxu1 %v980_v11  ;;  %879 = vmatpush3.bf16.msra.mxu0 %v981_v12 }
 0x1a8   :  { %v366_v24 = vpop.f32.mrf.mxu1  ;;  %v407_v25 = vpop.f32.mrf.mxu0 }
 0x1a9   :  { %v367_v26 = vadd.f32 %v366_v24, %v155_v20  ;;  %v408_v27 = vadd.f32 %v407_v25, %v163_v21 }
 0x1aa   :  { %v368_v28 = vpop.f32.mrf.mxu1  ;;  %v409_v29 = vpop.f32.mrf.mxu0 }
 0x1ab   :  { %v369_v30 = vadd.f32 %v368_v28, %v159_v22  ;;  %v410_v31 = vadd.f32 %v409_v29, %v167_v23  ;;  %v414_v32 = vmax.f32 %v367_v26, 0.0  ;;  %v416_v33 = vmax.f32 %v408_v27, 0.0 }
 0x1ac   :  { %v370_v34 = vpop.f32.mrf.mxu1  ;;  %v411_v35 = vpop.f32.mrf.mxu0 }
 0x1ad   :  { %v415_v36 = vmax.f32 %v369_v30, 0.0  ;;  %v417_v37 = vmax.f32 %v410_v31, 0.0  ;;  %v418_v42 = vpack.c.bf16 %v414_v32, %v414_v32  ;;  %v420_v43 = vpack.c.bf16 %v416_v33, %v416_v33 }
 0x1ae   :  { %v371_v38 = vpop.f32.mrf.mxu1  ;;  %v412_v39 = vpop.f32.mrf.mxu0 }
 0x1af   :  { %v419_v40 = vpack.c.bf16 %v415_v36, %v415_v36  ;;  %v421_v41 = vpack.c.bf16 %v417_v37, %v417_v37 }
 0x1b1   :  { %717 = vmatprep.mubr.bf16.mxu1 %v419_v40  ;;  %757 = vmatprep.mubr.bf16.mxu0 %v421_v41 }
 0x1b2   :  { %718 = vmatmul.mubr.bf16.vlgmr.msra.gmra.mxu1 %v418_v42  ;;  %758 = vmatmul.mubr.bf16.vlgmr.msra.gmra.mxu0 %v420_v43 }
 0x272   :  { %v858_v44 = vpop.f32.mrf.mxu1  ;;  %v880_v45 = vpop.f32.mrf.mxu0 }
 0x274   :  { %v859_v47 = vpop.f32.mrf.mxu1  ;;  %v881_v48 = vpop.f32.mrf.mxu0 }
 0x275   :  { %v860_v49 = vadd.f32 %v859_v47, %v858_v44  ;;  %v882_v53 = vadd.f32 %v881_v48, %v880_v45 }
 0x276   :  { %v861_v50 = vpop.f32.mrf.mxu1  ;;  %v883_v51 = vpop.f32.mrf.mxu0 }
 0x277   :  { %v720_v52 = vadd.f32 %v860_v49, %v807_v46 }
 0x278   :  { %v862_v54 = vpop.f32.mrf.mxu1  ;;  %v884_v55 = vpop.f32.mrf.mxu0 }
 0x279   :  { %v760_v56 = vadd.f32 %v882_v53, %v720_v52 }
 0x27b   :  { %765 = vst [vmem:[%s1106_s7] sm:$0xff] %v760_v56 }
 0x27c   :  { %770 = vsyncpa [#allocation3], 1 }
 0x27d   :  { %771 = vsyncpa [#allocation5], 1 }

</bundles_post_ra>
